<compile_context>
chip_gen: v7x
topology: tpu7x:2x2x1
jax: 0.10.0
libtpu: 0.0.40
codegen_flags: <defaults>
</compile_context>

<pallas_src>
import functools

import jax
import jax.numpy as jnp
from jax import lax
from jax.experimental import pallas as pl
from jax.experimental.pallas import tpu as pltpu


def _round_up(x, m):
    return (x + m - 1) // m * m


# ----------------------------- Pallas kernel ------------------------------- #

def _fused_kernel(p_ref, w1_ref, b1_ref, w2_ref, b2_ref, wfc_ref, bfc_ref,
                  feat_ref, logit_ref, acc_ref, *, tm, hw, hwp):
    """Fused stem conv + head 1x1 conv + global avg pool + FC.

    Channels live on sublanes, spatial (HW) lives on lanes -> lane-dense math.

    p_ref    : (1, Kp, tm)      bf16  im2col patch tile for this batch element
    w1_ref   : (C_stem, Kp)     bf16  stem weights (BN scale pre-folded)
    b1_ref   : (C_stem, 1)      f32
    w2_ref   : (C_head, C_stem) bf16  head weights (BN scale pre-folded)
    b2_ref   : (C_head, 1)      f32
    wfc_ref  : (NC, C_head)     f32
    bfc_ref  : (NC, 1)          f32
    feat_ref : (1, C_head, 1)   f32   pooled features (== dropout in eval)
    logit_ref: (1, NC, 1)       f32   FC logits
    acc_ref  : (C_head, tm)     f32   VMEM pool accumulator (persists across m)
    """
    m = pl.program_id(1)
    last_m = pl.num_programs(1) - 1

    @pl.when(m == 0)
    def _init():
        acc_ref[...] = jnp.zeros_like(acc_ref)

    # Stem conv (as matmul, spatial on lanes) -> f32 accumulate -> bias + SiLU.
    y = jnp.dot(w1_ref[...], p_ref[0],
                preferred_element_type=jnp.float32)            # (C_stem, tm)
    y = y + b1_ref[...]
    y = y * jax.nn.sigmoid(y)                                  # SiLU, f32 (v5e-safe)

    # Head 1x1 conv -> f32 accumulate -> bias + SiLU.
    z = jnp.dot(w2_ref[...], y.astype(w2_ref.dtype),
                preferred_element_type=jnp.float32)            # (C_head, tm)
    z = z + b2_ref[...]
    z = z * jax.nn.sigmoid(z)

    if hwp != hw:  # static: spatial dim was padded to a tile multiple
        # Only the last m-tile contains padded columns; mask only there.
        @pl.when(m != last_m)
        def _acc_full():
            acc_ref[...] += z

        @pl.when(m == last_m)
        def _acc_masked():
            cols = m * tm + lax.broadcasted_iota(jnp.int32, (1, tm), 1)
            acc_ref[...] += jnp.where(cols < hw, z, 0.0)
    else:
        acc_ref[...] += z

    @pl.when(m == last_m)
    def _finalize():
        # One cross-lane reduce at the very end; divide by HW once.
        pooled = jnp.sum(acc_ref[...], axis=1, keepdims=True) * (1.0 / hw)  # (C_head, 1)
        feat_ref[...] = pooled[None, :, :].astype(feat_ref.dtype)
        logits = jnp.dot(wfc_ref[...], pooled,
                         preferred_element_type=jnp.float32) + bfc_ref[...]
        logit_ref[...] = logits[None, :, :].astype(logit_ref.dtype)


def _fused_backbone_head(patches, w1, b1, w2, b2, wfc, bfc, *, hw, tm):
    b_sz, kp, hwp = patches.shape
    c_stem = w1.shape[0]
    c_head = w2.shape[0]
    nc = wfc.shape[0]
    num_m = hwp // tm

    flops = (2 * b_sz * hwp * (kp * c_stem + c_stem * c_head)
             + 2 * b_sz * c_head * nc)
    transcendentals = b_sz * hwp * (c_stem + c_head)
    bytes_accessed = (b_sz * hwp * kp * 2                         # bf16 patches
                      + (kp * c_stem + c_stem * c_head) * 2       # bf16 weights
                      + (c_stem + c_head + nc + c_head * nc) * 4  # f32 small params
                      + b_sz * (c_head + nc) * 4)                 # outputs

    kernel = functools.partial(_fused_kernel, tm=tm, hw=hw, hwp=hwp)

    feat3, logit3 = pl.pallas_call(
        kernel,
        out_shape=(jax.ShapeDtypeStruct((b_sz, c_head, 1), jnp.float32),
                   jax.ShapeDtypeStruct((b_sz, nc, 1), jnp.float32)),
        grid_spec=pltpu.PrefetchScalarGridSpec(
            num_scalar_prefetch=0,
            grid=(b_sz, num_m),
            in_specs=[
                pl.BlockSpec((1, kp, tm), lambda bi, mi: (bi, 0, mi)),
                pl.BlockSpec((c_stem, kp), lambda bi, mi: (0, 0)),
                pl.BlockSpec((c_stem, 1), lambda bi, mi: (0, 0)),
                pl.BlockSpec((c_head, c_stem), lambda bi, mi: (0, 0)),
                pl.BlockSpec((c_head, 1), lambda bi, mi: (0, 0)),
                pl.BlockSpec((nc, c_head), lambda bi, mi: (0, 0)),
                pl.BlockSpec((nc, 1), lambda bi, mi: (0, 0)),
            ],
            out_specs=(
                pl.BlockSpec((1, c_head, 1), lambda bi, mi: (bi, 0, 0)),
                pl.BlockSpec((1, nc, 1), lambda bi, mi: (bi, 0, 0)),
            ),
            scratch_shapes=[pltpu.VMEM((c_head, tm), jnp.float32)],
        ),
        compiler_params=pltpu.CompilerParams(
            # Batch axis shards across v7x's 2 TensorCores; m is the pool reduction.
            # TODO(synk): for B=1 on v7x, split the m axis across the 2 cores
            # (per-core partial pool accumulators combined at finalize).
            dimension_semantics=("parallel", "arbitrary"),
            vmem_limit_bytes=32 * 1024 * 1024,
        ),
        cost_estimate=pl.CostEstimate(
            flops=flops,
            transcendentals=transcendentals,
            bytes_accessed=bytes_accessed),
    )(patches, w1, b1, w2, b2, wfc, bfc)

    # Kernel emits per-batch column vectors; squeeze the trailing singleton.
    return feat3[:, :, 0], logit3[:, :, 0]


# ------------------------------- JAX glue ---------------------------------- #

def im2col_t(x_nhwc, kh, kw, stride, pad):
    """Extract conv patches in the transposed (B, K, HW) layout.

    K flat order is (kh, kw, C_in); HW flat order is row-major (Ho, Wo).
    """
    x = jnp.pad(x_nhwc, ((0, 0), (pad, pad), (pad, pad), (0, 0)))
    b, h, w, c = x.shape
    ho = (h - kh) // stride + 1
    wo = (w - kw) // stride + 1
    cols = []
    for i in range(kh):
        for j in range(kw):
            win = x[:, i:i + stride * ho:stride, j:j + stride * wo:stride, :]
            cols.append(jnp.transpose(win.reshape(b, ho * wo, c), (0, 2, 1)))
    patches = jnp.concatenate(cols, axis=1)              # (B, kh*kw*C, Ho*Wo)
    return patches, (b, ho, wo)


def _fold_bn(gamma, beta, mean, var, eps=1e-3):
    scale = gamma * jax.lax.rsqrt(var + eps)
    bias = beta - mean * scale
    return scale, bias


def _torch_conv_w_to_mm(w_oihw):
    """(Cout, Cin, kh, kw) -> (kh*kw*Cin, Cout) matching im2col flat K order."""
    return jnp.transpose(w_oihw, (2, 3, 1, 0)).reshape(-1, w_oihw.shape[0])


def init_params(key, c_in=3, c_stem=16, c_head=32, num_classes=10):
    ks = jax.random.split(key, 8)
    stem_w = 0.1 * jax.random.normal(ks[0], (c_stem, c_in, 3, 3), jnp.float32)
    head_w = 0.1 * jax.random.normal(ks[1], (c_head, c_stem, 1, 1), jnp.float32)
    fc_w = 0.1 * jax.random.normal(ks[2], (num_classes, c_head), jnp.float32)
    fc_b = 0.01 * jax.random.normal(ks[3], (num_classes,), jnp.float32)

    stem_scale, stem_bias = _fold_bn(
        1.0 + 0.05 * jax.random.normal(ks[4], (c_stem,), jnp.float32),
        0.05 * jax.random.normal(ks[5], (c_stem,), jnp.float32),
        jnp.zeros((c_stem,), jnp.float32), jnp.ones((c_stem,), jnp.float32))
    head_scale, head_bias = _fold_bn(
        1.0 + 0.05 * jax.random.normal(ks[6], (c_head,), jnp.float32),
        0.05 * jax.random.normal(ks[7], (c_head,), jnp.float32),
        jnp.zeros((c_head,), jnp.float32), jnp.ones((c_head,), jnp.float32))

    return dict(stem_w=stem_w, stem_scale=stem_scale, stem_bias=stem_bias,
                head_w=head_w, head_scale=head_scale, head_bias=head_bias,
                fc_w=fc_w, fc_b=fc_b)


def feature_extractor_efficientnet_forward(params, x_nchw, *, tm_max=4096):
    """Returns (features, logits) exactly like the PyTorch wrapper (eval mode)."""
    # Cast to bf16 BEFORE patch extraction so the materialized slab is bf16 and
    # already in the transposed (B, K, HW) layout the kernel consumes.
    x = jnp.transpose(x_nchw, (0, 2, 3, 1)).astype(jnp.bfloat16)         # NHWC

    # TODO(synk): stream the 3x3/s2 stem directly from the NHWC input inside the
    # kernel (9 shifted dots over halo'd blocks) to avoid the im2col slab in HBM.
    patches, (b, ho, wo) = im2col_t(x, 3, 3, stride=2, pad=1)            # (B, 27, HW)
    hw = ho * wo
    k = patches.shape[1]
    kp = _round_up(k, 32)                              # pad K 27 -> 32 (sublane axis)
    tm = min(tm_max, _round_up(hw, 128))               # spatial lane-tile, mult of 128
    hwp = _round_up(hw, tm)                            # pad HW to a tile multiple
    patches = jnp.pad(patches, ((0, 0), (0, kp - k), (0, hwp - hw)))     # bf16

    # Fold BN scale into the conv weights once; transpose so channels sit on
    # sublanes and the MXU output stays lane-dense (spatial on lanes).
    w1 = (_torch_conv_w_to_mm(params["stem_w"]) * params["stem_scale"][None, :]).T
    w1 = jnp.pad(w1, ((0, 0), (0, kp - k))).astype(jnp.bfloat16)         # (C_stem, Kp)
    b1 = params["stem_bias"][:, None].astype(jnp.float32)                # (C_stem, 1)
    w2 = (_torch_conv_w_to_mm(params["head_w"])
          * params["head_scale"][None, :]).T.astype(jnp.bfloat16)        # (C_head, C_stem)
    b2 = params["head_bias"][:, None].astype(jnp.float32)                # (C_head, 1)
    wfc = params["fc_w"].astype(jnp.float32)                             # (NC, C_head)
    bfc = params["fc_b"][:, None].astype(jnp.float32)                    # (NC, 1)

    # TODO(synk): training-mode dropout (stochastic masking) is not modeled;
    # eval-mode dropout is an identity, so features == pooled.
    return _fused_backbone_head(patches, w1, b1, w2, b2, wfc, bfc, hw=hw, tm=tm)


# --------------------------- pure-JAX reference ----------------------------- #

def _reference_forward(params, x_nchw):
    x = jnp.transpose(x_nchw, (0, 2, 3, 1)).astype(jnp.float32)
    patches, (b, ho, wo) = im2col_t(x, 3, 3, 2, 1)             # (B, K, HW) f32
    p2 = jnp.transpose(patches, (0, 2, 1)).reshape(b * ho * wo, -1)
    y = p2 @ _torch_conv_w_to_mm(params["stem_w"])
    y = y * params["stem_scale"] + params["stem_bias"]
    y = y * jax.nn.sigmoid(y)
    z = y @ _torch_conv_w_to_mm(params["head_w"])
    z = z * params["head_scale"] + params["head_bias"]
    z = z * jax.nn.sigmoid(z)
    pooled = z.reshape(b, ho * wo, -1).mean(axis=1)
    logits = pooled @ params["fc_w"].T + params["fc_b"]
    return pooled, logits


if __name__ == "__main__":
    key = jax.random.PRNGKey(0)
    k_param, k_x = jax.random.split(key)
    params = init_params(k_param)

    # Small NCHW input, consistent with the PyTorch module's conv-net input.
    x = jax.random.normal(k_x, (2, 3, 16, 16), jnp.float32)

    features, logits = jax.jit(feature_extractor_efficientnet_forward)(params, x)
    jax.block_until_ready((features, logits))

    ref_features, ref_logits = _reference_forward(params, x)
    assert features.shape == (2, 32) and logits.shape == (2, 10)
    # bf16 MXU inputs (f32 accumulate) vs pure-f32 reference -> loose tolerance.
    assert jnp.allclose(features, ref_features, atol=2e-2, rtol=2e-2)
    assert jnp.allclose(logits, ref_logits, atol=2e-2, rtol=2e-2)

    print("KERNEL_OK")
</pallas_src>

<mosaic_0001>
module attributes {stable_mosaic.version = 11 : i64} {
  func.func @_fused_kernel(%arg0: i32, %arg1: i32, %arg2: memref<1x32x128xbf16, #tpu.memory_space<vmem>>, %arg3: memref<16x32xbf16, #tpu.memory_space<vmem>>, %arg4: memref<16x1xf32, #tpu.memory_space<vmem>>, %arg5: memref<32x16xbf16, #tpu.memory_space<vmem>>, %arg6: memref<32x1xf32, #tpu.memory_space<vmem>>, %arg7: memref<10x32xf32, #tpu.memory_space<vmem>>, %arg8: memref<10x1xf32, #tpu.memory_space<vmem>>, %arg9: memref<1x32x1xf32, #tpu.memory_space<vmem>>, %arg10: memref<1x10x1xf32, #tpu.memory_space<vmem>>, %arg11: memref<32x128xf32, #tpu.memory_space<vmem>>) attributes {dimension_semantics = [#tpu.dimension_semantics<parallel>, #tpu.dimension_semantics<arbitrary>], iteration_bounds = array<i64: 2, 1>, scalar_prefetch = 0 : i64, scratch_operands = 1 : i64, tpu.core_type = #tpu.core_type<tc>, window_params = [{transform_indices = @transform_0, window_bounds = array<i64: 1, 32, 128>}, {pipeline_mode = #tpu.pipeline_mode<synchronous>, transform_indices = @transform_1, window_bounds = array<i64: 16, 32>}, {pipeline_mode = #tpu.pipeline_mode<synchronous>, transform_indices = @transform_2, window_bounds = array<i64: 16, 1>}, {pipeline_mode = #tpu.pipeline_mode<synchronous>, transform_indices = @transform_3, window_bounds = array<i64: 32, 16>}, {pipeline_mode = #tpu.pipeline_mode<synchronous>, transform_indices = @transform_4, window_bounds = array<i64: 32, 1>}, {pipeline_mode = #tpu.pipeline_mode<synchronous>, transform_indices = @transform_5, window_bounds = array<i64: 10, 32>}, {pipeline_mode = #tpu.pipeline_mode<synchronous>, transform_indices = @transform_6, window_bounds = array<i64: 10, 1>}, {transform_indices = @transform_7, window_bounds = array<i64: 1, 32, 1>}, {transform_indices = @transform_8, window_bounds = array<i64: 1, 10, 1>}]} {
    %c0_i32 = arith.constant 0 : i32
    %0 = arith.cmpi eq, %arg1, %c0_i32 : i32
    %1 = arith.extui %0 : i1 to i32
    %c0_i32_0 = arith.constant 0 : i32
    %2 = arith.cmpi ne, %1, %c0_i32_0 : i32
    scf.if %2 {
      %cst_20 = arith.constant 0.000000e+00 : f32
      %37 = vector.broadcast %cst_20 : f32 to vector<32x128xf32>
      %c0_21 = arith.constant 0 : index
      %c0_22 = arith.constant 0 : index
      %38 = vector.load %arg11[%c0_21, %c0_22] : memref<32x128xf32, #tpu.memory_space<vmem>>, vector<32x128xf32>
      tpu.vector_store %arg11[%c0_21, %c0_22], %37 {strides = array<i32>} : memref<32x128xf32, #tpu.memory_space<vmem>>, vector<32x128xf32>,
    } else {
    }
    %c0 = arith.constant 0 : index
    %c0_1 = arith.constant 0 : index
    %3 = vector.load %arg3[%c0, %c0_1] : memref<16x32xbf16, #tpu.memory_space<vmem>>, vector<16x32xbf16>
    %c0_2 = arith.constant 0 : index
    %c0_3 = arith.constant 0 : index
    %c0_4 = arith.constant 0 : index
    %4 = vector.load %arg2[%c0_2, %c0_3, %c0_4] : memref<1x32x128xbf16, #tpu.memory_space<vmem>>, vector<1x32x128xbf16>
    %5 = vector.shape_cast %4 : vector<1x32x128xbf16> to vector<32x128xbf16>
    %cst = arith.constant dense<0.000000e+00> : vector<16x128xf32>
    %6 = tpu.matmul %3, %5, %cst {dimension_numbers = #tpu.dot_dimension_numbers<[1], [0], [0], [1], [0, 0, 1, 1], [], []>} : vector<16x32xbf16>, vector<32x128xbf16>, vector<16x128xf32> -> vector<16x128xf32>
    %c0_5 = arith.constant 0 : index
    %c0_6 = arith.constant 0 : index
    %7 = vector.load %arg4[%c0_5, %c0_6] : memref<16x1xf32, #tpu.memory_space<vmem>>, vector<16x1xf32>
    %8 = vector.broadcast %7 : vector<16x1xf32> to vector<16x128xf32>
    %9 = arith.addf %6, %8 : vector<16x128xf32>
    %10 = arith.negf %9 : vector<16x128xf32>
    %11 = math.exp %10 : vector<16x128xf32>
    %cst_7 = arith.constant 1.000000e+00 : f32
    %12 = vector.broadcast %cst_7 : f32 to vector<16x128xf32>
    %13 = arith.addf %12, %11 : vector<16x128xf32>
    %14 = arith.divf %12, %13 : vector<16x128xf32>
    %15 = arith.mulf %9, %14 : vector<16x128xf32>
    %c0_8 = arith.constant 0 : index
    %c0_9 = arith.constant 0 : index
    %16 = vector.load %arg5[%c0_8, %c0_9] : memref<32x16xbf16, #tpu.memory_space<vmem>>, vector<32x16xbf16>
    %17 = arith.truncf %15 : vector<16x128xf32> to vector<16x128xbf16>
    %cst_10 = arith.constant dense<0.000000e+00> : vector<32x128xf32>
    %18 = tpu.matmul %16, %17, %cst_10 {dimension_numbers = #tpu.dot_dimension_numbers<[1], [0], [0], [1], [0, 0, 1, 1], [], []>} : vector<32x16xbf16>, vector<16x128xbf16>, vector<32x128xf32> -> vector<32x128xf32>
    %c0_11 = arith.constant 0 : index
    %c0_12 = arith.constant 0 : index
    %19 = vector.load %arg6[%c0_11, %c0_12] : memref<32x1xf32, #tpu.memory_space<vmem>>, vector<32x1xf32>
    %20 = vector.broadcast %19 : vector<32x1xf32> to vector<32x128xf32>
    %21 = arith.addf %18, %20 : vector<32x128xf32>
    %22 = arith.negf %21 : vector<32x128xf32>
    %23 = math.exp %22 : vector<32x128xf32>
    %cst_13 = arith.constant 1.000000e+00 : f32
    %24 = vector.broadcast %cst_13 : f32 to vector<32x128xf32>
    %25 = arith.addf %24, %23 : vector<32x128xf32>
    %26 = arith.divf %24, %25 : vector<32x128xf32>
    %27 = arith.mulf %21, %26 : vector<32x128xf32>
    %c0_i32_14 = arith.constant 0 : i32
    %28 = arith.cmpi ne, %arg1, %c0_i32_14 : i32
    %29 = arith.extui %28 : i1 to i32
    %c0_i32_15 = arith.constant 0 : i32
    %30 = arith.cmpi ne, %29, %c0_i32_15 : i32
    scf.if %30 {
      %c0_20 = arith.constant 0 : index
      %c0_21 = arith.constant 0 : index
      %37 = vector.load %arg11[%c0_20, %c0_21] : memref<32x128xf32, #tpu.memory_space<vmem>>, vector<32x128xf32>
      %38 = arith.addf %37, %27 : vector<32x128xf32>
      %c0_22 = arith.constant 0 : index
      %c0_23 = arith.constant 0 : index
      %39 = vector.load %arg11[%c0_22, %c0_23] : memref<32x128xf32, #tpu.memory_space<vmem>>, vector<32x128xf32>
      tpu.vector_store %arg11[%c0_22, %c0_23], %38 {strides = array<i32>} : memref<32x128xf32, #tpu.memory_space<vmem>>, vector<32x128xf32>,
    } else {
    }
    %c0_i32_16 = arith.constant 0 : i32
    %31 = arith.cmpi eq, %arg1, %c0_i32_16 : i32
    %32 = arith.extui %31 : i1 to i32
    %c0_i32_17 = arith.constant 0 : i32
    %33 = arith.cmpi ne, %32, %c0_i32_17 : i32
    scf.if %33 {
      %c128_i32 = arith.constant 128 : i32
      %37 = arith.muli %arg1, %c128_i32 : i32
      %38 = tpu.iota {dimensions = array<i32: 1>} : vector<1x128xi32>
      %39 = vector.broadcast %37 : i32 to vector<1x128xi32>
      %40 = arith.addi %39, %38 : vector<1x128xi32>
      %c0_20 = arith.constant 0 : index
      %c0_21 = arith.constant 0 : index
      %41 = vector.load %arg11[%c0_20, %c0_21] : memref<32x128xf32, #tpu.memory_space<vmem>>, vector<32x128xf32>
      %c64_i32 = arith.constant 64 : i32
      %42 = vector.broadcast %c64_i32 : i32 to vector<1x128xi32>
      %43 = arith.cmpi slt, %40, %42 : vector<1x128xi32>
      %cst_22 = arith.constant 0.000000e+00 : f32
      %44 = vector.shape_cast %43 : vector<1x128xi1> to vector<1x128xi1>
      %45 = vector.broadcast %44 : vector<1x128xi1> to vector<32x128xi1>
      %46 = vector.broadcast %cst_22 : f32 to vector<32x128xf32>
      %47 = arith.select %45, %27, %46 : vector<32x128xi1>, vector<32x128xf32>
      %48 = arith.addf %41, %47 : vector<32x128xf32>
      %c0_23 = arith.constant 0 : index
      %c0_24 = arith.constant 0 : index
      %49 = vector.load %arg11[%c0_23, %c0_24] : memref<32x128xf32, #tpu.memory_space<vmem>>, vector<32x128xf32>
      tpu.vector_store %arg11[%c0_23, %c0_24], %48 {strides = array<i32>} : memref<32x128xf32, #tpu.memory_space<vmem>>, vector<32x128xf32>,
    } else {
    }
    %c0_i32_18 = arith.constant 0 : i32
    %34 = arith.cmpi eq, %arg1, %c0_i32_18 : i32
    %35 = arith.extui %34 : i1 to i32
    %c0_i32_19 = arith.constant 0 : i32
    %36 = arith.cmpi ne, %35, %c0_i32_19 : i32
    scf.if %36 {
      %c0_20 = arith.constant 0 : index
      %c0_21 = arith.constant 0 : index
      %37 = vector.load %arg11[%c0_20, %c0_21] : memref<32x128xf32, #tpu.memory_space<vmem>>, vector<32x128xf32>
      %cst_22 = arith.constant dense<0.000000e+00> : vector<32xf32>
      %38 = vector.multi_reduction <add>, %37, %cst_22 [1] : vector<32x128xf32> to vector<32xf32>
      %39 = vector.shape_cast %38 : vector<32xf32> to vector<32x1xf32>
      %cst_23 = arith.constant 1.562500e-02 : f32
      %40 = vector.broadcast %cst_23 : f32 to vector<32x1xf32>
      %41 = arith.mulf %39, %40 : vector<32x1xf32>
      %42 = vector.shape_cast %41 : vector<32x1xf32> to vector<1x32x1xf32>
      %c0_24 = arith.constant 0 : index
      %c0_25 = arith.constant 0 : index
      %c0_26 = arith.constant 0 : index
      %43 = vector.load %arg9[%c0_24, %c0_25, %c0_26] : memref<1x32x1xf32, #tpu.memory_space<vmem>>, vector<1x32x1xf32>
      tpu.vector_store %arg9[%c0_24, %c0_25, %c0_26], %42 {strides = array<i32>} : memref<1x32x1xf32, #tpu.memory_space<vmem>>, vector<1x32x1xf32>,
      %c0_27 = arith.constant 0 : index
      %c0_28 = arith.constant 0 : index
      %44 = vector.load %arg7[%c0_27, %c0_28] : memref<10x32xf32, #tpu.memory_space<vmem>>, vector<10x32xf32>
      %cst_29 = arith.constant dense<0.000000e+00> : vector<10x1xf32>
      %45 = tpu.matmul %44, %41, %cst_29 {dimension_numbers = #tpu.dot_dimension_numbers<[1], [0], [0], [1], [0, 0, 1, 1], [], []>} : vector<10x32xf32>, vector<32x1xf32>, vector<10x1xf32> -> vector<10x1xf32>
      %c0_30 = arith.constant 0 : index
      %c0_31 = arith.constant 0 : index
      %46 = vector.load %arg8[%c0_30, %c0_31] : memref<10x1xf32, #tpu.memory_space<vmem>>, vector<10x1xf32>
      %47 = arith.addf %45, %46 : vector<10x1xf32>
      %48 = vector.shape_cast %47 : vector<10x1xf32> to vector<1x10x1xf32>
      %c0_32 = arith.constant 0 : index
      %c0_33 = arith.constant 0 : index
      %c0_34 = arith.constant 0 : index
      %49 = vector.load %arg10[%c0_32, %c0_33, %c0_34] : memref<1x10x1xf32, #tpu.memory_space<vmem>>, vector<1x10x1xf32>
      tpu.vector_store %arg10[%c0_32, %c0_33, %c0_34], %48 {strides = array<i32>} : memref<1x10x1xf32, #tpu.memory_space<vmem>>, vector<1x10x1xf32>,
    } else {
    }
    return
  }
  func.func @transform_0(%arg0: i32, %arg1: i32) -> (i32, i32, i32) {
    %c0_i32 = arith.constant 0 : i32
    %c0_i32_0 = arith.constant 0 : i32
    return %arg0, %c0_i32, %arg1 : i32, i32, i32
  }
  func.func @transform_1(%arg0: i32, %arg1: i32) -> (i32, i32) {
    %c0_i32 = arith.constant 0 : i32
    %c0_i32_0 = arith.constant 0 : i32
    %c0_i32_1 = arith.constant 0 : i32
    return %c0_i32, %c0_i32_0 : i32, i32
  }
  func.func @transform_2(%arg0: i32, %arg1: i32) -> (i32, i32) {
    %c0_i32 = arith.constant 0 : i32
    %c0_i32_0 = arith.constant 0 : i32
    %c0_i32_1 = arith.constant 0 : i32
    return %c0_i32, %c0_i32_0 : i32, i32
  }
  func.func @transform_3(%arg0: i32, %arg1: i32) -> (i32, i32) {
    %c0_i32 = arith.constant 0 : i32
    %c0_i32_0 = arith.constant 0 : i32
    %c0_i32_1 = arith.constant 0 : i32
    return %c0_i32, %c0_i32_0 : i32, i32
  }
  func.func @transform_4(%arg0: i32, %arg1: i32) -> (i32, i32) {
    %c0_i32 = arith.constant 0 : i32
    %c0_i32_0 = arith.constant 0 : i32
    %c0_i32_1 = arith.constant 0 : i32
    return %c0_i32, %c0_i32_0 : i32, i32
  }
  func.func @transform_5(%arg0: i32, %arg1: i32) -> (i32, i32) {
    %c0_i32 = arith.constant 0 : i32
    %c0_i32_0 = arith.constant 0 : i32
    %c0_i32_1 = arith.constant 0 : i32
    return %c0_i32, %c0_i32_0 : i32, i32
  }
  func.func @transform_6(%arg0: i32, %arg1: i32) -> (i32, i32) {
    %c0_i32 = arith.constant 0 : i32
    %c0_i32_0 = arith.constant 0 : i32
    %c0_i32_1 = arith.constant 0 : i32
    return %c0_i32, %c0_i32_0 : i32, i32
  }
  func.func @transform_7(%arg0: i32, %arg1: i32) -> (i32, i32, i32) {
    %c0_i32 = arith.constant 0 : i32
    %c0_i32_0 = arith.constant 0 : i32
    %c0_i32_1 = arith.constant 0 : i32
    return %arg0, %c0_i32, %c0_i32_0 : i32, i32, i32
  }
  func.func @transform_8(%arg0: i32, %arg1: i32) -> (i32, i32, i32) {
    %c0_i32 = arith.constant 0 : i32
    %c0_i32_0 = arith.constant 0 : i32
    %c0_i32_1 = arith.constant 0 : i32
    return %arg0, %c0_i32, %c0_i32_0 : i32, i32, i32
  }
}

</mosaic_0001>

<bundles_post_ra>
// kernel: feature_extractor_efficientnet_forward.1
= control target key start
LH: loop header
LB: loop body
LE: loop exit
PB: predicated region body
PF: predicated region fallthrough
CT: control target
= control target key end

     0   :  { %s1029_s27 = smov 0   ;;  %s1031_s28 = smov 0   ;;  %s1122_s0 = inlined_call_operand.vmem [shape: bf16[2,32,128], index: 0, kind: input, shape index: {}]   ;;  %s1123_s1 = inlined_call_operand.vmem [shape: bf16[16,32], index: 1, kind: input, shape index: {}]   ;;  %s1124_s2 = inlined_call_operand.vmem [shape: f32[16,1], index: 2, kind: input, shape index: {}]   ;;  %s1125_s3 = inlined_call_operand.vmem [shape: bf16[32,16], index: 3, kind: input, shape index: {}]   ;;  %s1126_s4 = inlined_call_operand.vmem [shape: f32[32,1], index: 4, kind: input, shape index: {}]   ;;  %s1127_s5 = inlined_call_operand.vmem [shape: f32[10,32], index: 5, kind: input, shape index: {}]   ;;  %s1128_s6 = inlined_call_operand.vmem [shape: f32[10,1], index: 6, kind: input, shape index: {}]   ;;  %s1129_s7 = inlined_call_operand.vmem [shape: f32[2,32,1], index: 7, kind: output, shape index: {0}]   ;;  %s1130_s8 = inlined_call_operand.vmem [shape: f32[2,10,1], index: 8, kind: output, shape index: {1}]  }
   0x1   :  { %s1033_s29 = smov 0  }
   0x2 LB: > { %s31_s30 = sadd.s32 1, %s975_s28  ;;  %p826_p0 = scmp.ge.s32.totalorder %s979_s29, 1  ;;  %s979_s29 = sphi %s1033_s29, %s19_s29   ;;  %s975_s28 = sphi %s1031_s28, %s1132_s28   ;;  %s971_s27 = sphi %s1029_s27, %s1131_s27  }
   0x3   : > { %p33_p1 = scmp.ge.s32.totalorder %s31_s30, 2  ;;  %p282_p2 = scmp.lt.s32.totalorder %s979_s29, 3 }
   0x5   : > { %s1134_s30 = smov (%p33_p1, %s31_s30), 0  ;;  %p283_p3 = pnand %p826_p0, %p282_p2 }
   0x6   : > { %p324_p4 = scmp.lt.s32.totalorder (!%p283_p3), %s971_s27, 1  ;;  %v981_v0 = vmov (!%p283_p3), 0.0   ;;  %vm982_vm0 = vmmov (!%p283_p3), 0   ;;  %v357_v1 = vld [vmem:[%s1124_s2] sm:$0xff] (!%p283_p3)  ;;  %v983_v2 = vmov (!%p283_p3), 0   ;;  %v358_v3 = vld [vmem:[%s1124_s2 + $0x8] sm:$0xff] (!%p283_p3)  ;;  %v588_v56 = vlaneseq (!%p283_p3) }
   0x7   : > { %286 = sbr.rel (%p283_p3) target bundleno = 893 (0x37d), region = 48  ;;  %866 = vmatprep.subr.bf16.mxu0 (!%p283_p3), %v981_v0  ;;  %870 = vmatprep.mubr.msk.bf16.mxu0 (!%p283_p3), %vm982_vm0, %v981_v0  ;;  %v452_v6 = vld [vmem:[%s1126_s4 + $0x10] sm:$0xff] (!%p283_p3)  ;;  %v930_v7 = vld [vmem:[%s1123_s1] sm:$0xff] (!%p283_p3)   ;;  %vm386_vm1 = vcmask (!%p283_p3), 261120   ;;  %vm484_vm2 = vcmask (!%p283_p3), 130048   ;;  %v451_v10 = vld [vmem:[%s1126_s4 + $0x8] sm:$0xff] (!%p283_p3) }
   0x8   : > { %926 = vset.pattern.permute.xlu0 (!%p283_p3), %v983_v2  ;;  %927 = vset.pattern.permute.xlu1 (!%p283_p3), %v983_v2  ;;  %v931_v8 = vld [vmem:[%s1125_s3] sm:$0xff] (!%p283_p3)   ;;  %v453_v11 = vld [vmem:[%s1126_s4 + $0x18] sm:$0xff] (!%p283_p3)  ;;  %v932_v31 = vld [vmem:[%s1125_s3 + $0x8] sm:$0xff] (!%p283_p3)   ;;  %v589_v57 = vand.u32 (!%p283_p3), 127, %v588_v56  ;;  %vm627_vm4 = vcmask (!%p283_p3), 7168   ;;  %vm718_vm5 = vcmask (!%p283_p3), 1024  }
   0x9   : > { %361 = vperm.xlu0 (!%p283_p3), %926, %v357_v1   ;;  %876 = vmatprep.mubr.msk.bf16.mxu1 (!%p283_p3), %vm484_vm2, %v931_v8  ;;  %v450_v9 = vld [vmem:[%s1126_s4] sm:$0xff] (!%p283_p3) }
   0xa   : > { %456 = vperm.xlu1 (!%p283_p3), %927, %v450_v9   ;;  %vm596_vm3 = vcmp.lt.s32.totalorder (!%p283_p3), %v589_v57, 64 }
   0xd   : > { %366 = vperm.xlu0 (!%p283_p3), %926, %v358_v3  }
   0xe   : > { %s1136_s27 = smov (!%p324_p4, %s971_s27), 1  ;;  %461 = vperm.xlu1 %927, %v451_v10  }
   0xf   : > { %s851_s11 = sshll.u32 %s1136_s27, 4 }
  0x10   : > { %s331_s16 = scalar_lea.vmem %s1122_s0, %s851_s11  ;;  %s341_s10 = scalar_lea.vmem %s1130_s8, %s851_s11 }
  0x11   : > { %v928_v4 = vld [vmem:[%s331_s16] sm:$0xff]   ;;  %v929_v5 = vld [vmem:[%s331_s16 + $0x8] sm:$0xff]   ;;  %466 = vperm.xlu0 %926, %v452_v6   ;;  %s852_s16 = sshll.u32 %s1136_s27, 5 }
  0x12   : > { %867 = vmatpush3.bf16.msra.mxu0 %v928_v4  ;;  %471 = vperm.xlu1 %927, %v453_v11   ;;  %v632_v6 = vld [vmem:[%s1127_s5] sm:$0xff]  ;;  %s336_s19 = scalar_lea.vmem %s1129_s7, %s852_s16 }
  0x13   : > { %868 = vmatprep.subr.bf16.mxu0 %v981_v0 }
  0x16   : > { %869 = vmatpush3.bf16.msra.mxu0 %v929_v5 }
  0x19   : > { %871 = vmatmul.mubr.msk.bf16.vlgmr.msra.gmra.mrb[0].mxu0 %vm386_vm1, %v930_v7 }
  0x88   : > { %v362_v12 = vpop.permute.xlu0 %361 }
  0x89   : > { %v457_v32 = vpop.permute.xlu1 %456 }
  0x8c   : > { %v367_v16 = vpop.permute.xlu0 %366 }
  0x8d   : > { %v462_v33 = vpop.permute.xlu1 %461 }
  0x90   : > { %v467_v34 = vpop.permute.xlu0 %466 }
  0x91   : > { %v472_v36 = vpop.permute.xlu1 %471 }
  0xec   : > { %v424_v13 = vpop.f32.mrb[0].mxu0 }
  0xed   : > { %v425_v14 = vadd.f32 %v424_v13, %v362_v12  ;;  %v872_v15 = vpop.f32.mrb[1].mxu0 }
  0xee   : > { %v427_v17 = vpop.f32.mrb[2].mxu0 }
  0xef   : > { %v837_v18 = vmul.f32 -1.442695, %v425_v14  ;;  %v428_v19 = vadd.f32 %v427_v17, %v367_v16  ;;  %v873_v20 = vpop.f32.mrb[3].mxu0  ;;  %v633_v17 = vld [vmem:[%s1127_s5 + $0x8] sm:$0x3] }
  0xf1   : > { %933 = vpow2.f32 %v837_v18  ;;  %v838_v21 = vmul.f32 -1.442695, %v428_v19  ;;  %v635_v18 = vld [vmem:[%s1128_s6 + $0x8] sm:$0x3] }
  0xf3   : > { %935 = vpow2.f32 %v838_v21 }
  0xfb   : > { %v934_v22 = vpop.eup %933 }
  0xfc   : > { %v437_v23 = vadd.f32 1.0, %v934_v22 }
  0xfd   : > { %v936_v24 = vpop.eup %935 }
  0xfe   : > { %937 = vrcp.f32 %v437_v23  ;;  %v438_v25 = vadd.f32 1.0, %v936_v24 }
 0x100   : > { %939 = vrcp.f32 %v438_v25 }
 0x108   : > { %v938_v26 = vpop.eup %937 }
 0x109   : > { %v443_v28 = vmul.f32 %v938_v26, %v425_v14 }
 0x10a   : > { %v940_v27 = vpop.eup %939 }
 0x10b   : > { %v444_v29 = vmul.f32 %v940_v27, %v428_v19  ;;  %v634_v19 = vld [vmem:[%s1128_s6] sm:$0xff] }
 0x10d   : > { %v449_v30 = vpack.c.bf16 %v444_v29, %v443_v28 }
 0x10f   : > { %874 = vmatprep.subr.bf16.mxu1 %v449_v30 }
 0x110   : > { %875 = vmatpush3.bf16.msra.mxu1 %v449_v30 }
 0x113   : > { %877 = vmatmul.mubr.msk.bf16.vlgmr.msra.gmra.mrb[0].mxu1 %vm484_vm2, %v932_v31 }
 0x114   : > { %888 = vmatprep.mubr.msk.f32.mxu1 %vm386_vm1, %v632_v6 }
 0x1e6   : > { %v878_v35 = vpop.f32.mrb[0].mxu1 }
 0x1e7   : > { %v534_v37 = vadd.f32 %v878_v35, %v467_v34  ;;  %v525_v38 = vpop.f32.mrb[1].mxu1 }
 0x1e8   : > { %v526_v39 = vadd.f32 %v525_v38, %v457_v32  ;;  %v879_v40 = vpop.f32.mrb[2].mxu1 }
 0x1e9   : > { %v845_v41 = vmul.f32 -1.442695, %v534_v37  ;;  %v537_v42 = vadd.f32 %v879_v40, %v472_v36  ;;  %v528_v43 = vpop.f32.mrb[3].mxu1 }
 0x1ea   : > { %v843_v44 = vmul.f32 -1.442695, %v526_v39  ;;  %v529_v45 = vadd.f32 %v528_v43, %v462_v33 }
 0x1eb   : > { %941 = vpow2.f32 %v845_v41  ;;  %v846_v46 = vmul.f32 -1.442695, %v537_v42 }
 0x1ec   : > { %943 = vpow2.f32 %v843_v44  ;;  %v844_v47 = vmul.f32 -1.442695, %v529_v45 }
 0x1ed   : > { %945 = vpow2.f32 %v846_v46 }
 0x1ee   : > { %947 = vpow2.f32 %v844_v47 }
 0x1f5   : > { %v942_v48 = vpop.eup %941 }
 0x1f6   : > { %v944_v49 = vpop.eup %943  ;;  %v554_v50 = vadd.f32 1.0, %v942_v48 }
 0x1f7   : > { %v946_v51 = vpop.eup %945  ;;  %v552_v52 = vadd.f32 1.0, %v944_v49 }
 0x1f8   : > { %v948_v53 = vpop.eup %947  ;;  %949 = vrcp.f32 %v554_v50  ;;  %v555_v54 = vadd.f32 1.0, %v946_v51 }
 0x1f9   : > { %951 = vrcp.f32 %v552_v52  ;;  %v553_v55 = vadd.f32 1.0, %v948_v53 }
 0x1fb   : > { %953 = vrcp.f32 %v553_v55 }
 0x1fc   : > { %955 = vrcp.f32 %v555_v54 }
 0x202   : > { %v950_v58 = vpop.eup %949 }
 0x203   : > { %v952_v59 = vpop.eup %951  ;;  %v566_v0 = vmul.f32 %v950_v58, %v534_v37 }
 0x204   : > { %v564_v60 = vmul.f32 %v952_v59, %v526_v39 }
 0x205   : > { %v954_v61 = vpop.eup %953  ;;  %v601_v3 = vsel %vm596_vm3, %v566_v0, 0.0 }
 0x206   : > { %v599_v62 = vsel %vm596_vm3, %v564_v60, 0.0  ;;  %v565_v63 = vmul.f32 %v954_v61, %v529_v45  ;;  %v956_v1 = vpop.eup %955 }
 0x207   : > { %615 = vadd.xlane.f32.xlu0 %v599_v62  ;;  %v567_v4 = vmul.f32 %v956_v1, %v537_v42 }
 0x208   : > { %v600_v2 = vsel %vm596_vm3, %v565_v63, 0.0 }
 0x209   : > { %617 = vadd.xlane.f32.xlu1 %v600_v2  ;;  %v602_v5 = vsel %vm596_vm3, %v567_v4, 0.0 }
 0x20b   : > { %619 = vadd.xlane.f32.xlu0 %v601_v3 }
 0x20f   : > { %621 = vadd.xlane.f32.xlu0 %v602_v5 }
 0x294   : > { %v616_v7 = vpop.xlane.xlu0 %615 }
 0x295   : > { %v623_v8 = vmul.f32 0.015625, %v616_v7 }
 0x296   : > { %v618_v9 = vpop.xlane.xlu1 %617 }
 0x297   : > { %628 = vst.msk [vmem:[%s336_s19] sm:$0xff] %vm627_vm4, %v623_v8  ;;  %v624_v10 = vmul.f32 0.015625, %v618_v9 }
 0x298   : > { %v620_v11 = vpop.xlane.xlu0 %619 }
 0x299   : > { %629 = vst.msk [vmem:[%s336_s19 + $0x8] sm:$0xff] %vm627_vm4, %v624_v10  ;;  %v891_v12 = vpack.c.bf16 %v624_v10, %v623_v8  ;;  %v625_v13 = vmul.f32 0.015625, %v620_v11 }
 0x29b   : > { %630 = vst.msk [vmem:[%s336_s19 + $0x10] sm:$0xff] %vm627_vm4, %v625_v13  ;;  %892 = vmatprep.subr.bf16.mxu1 %v891_v12 }
 0x29c   : > { %894 = vmatpush3.bf16.msra.mxu1 %v891_v12  ;;  %v622_v14 = vpop.xlane.xlu0 %621 }
 0x29d   : > { %v626_v15 = vmul.f32 0.015625, %v622_v14 }
 0x29f   : > { %631 = vst.msk [vmem:[%s336_s19 + $0x18] sm:$0xff] %vm627_vm4, %v626_v15  ;;  %v895_v16 = vpack.c.bf16 %v626_v15, %v625_v13 }
 0x2a1   : > { %896 = vmatprep.subr.bf16.mxu1 %v895_v16 }
 0x2a2   : > { %898 = vmatpush3.bf16.msra.mxu1 %v895_v16 }
 0x2a5   : > { %889 = vmatmul.mubr.msk.f32.vlgmr.msra.gmra.mrb[4].mxu1 %vm386_vm1, %v633_v17 }
 0x378   : > { %v890_v20 = vpop.f32.mrb[4].mxu1 }
 0x379   : > { %v714_v21 = vadd.f32 %v890_v20, %v635_v18  ;;  %v708_v22 = vpop.f32.mrb[5].mxu1 }
 0x37a   : > { %v709_v23 = vadd.f32 %v708_v22, %v634_v19 }
 0x37b   : > { %719 = vst.msk [vmem:[%s341_s10 + $0x8] sm:$0x3] %vm718_vm5, %v714_v21 }
 0x37c   : > { %717 = vst.msk [vmem:[%s341_s10] sm:$0xff] %vm627_vm4, %v709_v23 }
 0x37d PF: > { %s19_s29 = sadd.s32 1, %s979_s29   ;;  %s1131_s27 = smov %s975_s28 }
 0x37e   : > { %p16_p5 = scmp.ge.s32.totalorder %s19_s29, 4   ;;  %s1132_s28 = smov %s1134_s30 }
 0x380   :  { %18 = sbr.rel (!%p16_p5) target bundleno = 2 (0x2), region = 102 }

</bundles_post_ra>
